<compile_context>
chip_gen: v6e
topology: v6e:2x2x1
jax: 0.10.0
libtpu: 0.0.40
codegen_flags: <defaults>
</compile_context>

<pallas_src>
import jax
import jax.numpy as jnp
from jax import lax
from jax.experimental import pallas as pl
from jax.experimental.pallas import tpu as pltpu

EXPANSION = 4
EPS = 1e-5
LANE = 128
SUB = 8
ROW_TILE_TARGET = 256   # rows per grid step (>=512 preferred on v6e/v7x at real shapes)


def _round_up(v, m):
    return (v + m - 1) // m * m


def _row_tiling(rows, target=ROW_TILE_TARGET):
    """Sublane-aligned row tile; rows are zero-padded up to a tile multiple."""
    tile = min(target, _round_up(rows, SUB))
    padded = _round_up(rows, tile)
    return tile, padded, padded // tile


def _cparams(work_bytes):
    # VMEM budget from the per-step working set; cap for v7x (64 MiB physical),
    # floor so Mosaic internal scratch / double buffering has headroom.
    limit = int(min(48 << 20, max(16 << 20, 4 * work_bytes)))
    return pltpu.CompilerParams(dimension_semantics=("parallel",),
                                vmem_limit_bytes=limit)


def _finalize_bn(partial_stats, count, gamma, beta):
    """Combine per-tile (sum, sum_sq) partials into a BN scale/shift pair."""
    tot = jnp.sum(partial_stats, axis=0)                  # (2, C)
    mean = tot[0] / count
    # TODO(synk): E[x^2]-E[x]^2 can cancel for large-mean activations at scale;
    # a Welford/Chan-style tile combine would be more robust.
    var = jnp.maximum(tot[1] / count - mean * mean, 0.0)
    scale = gamma.reshape(-1) * lax.rsqrt(var + EPS)
    shift = beta.reshape(-1) - mean * scale
    return scale.reshape(1, -1), shift.reshape(1, -1)


# --------------------------- pass 1: conv1 (1x1) ------------------------------
def _conv1_kernel(x_ref, w_ref, y_ref, st_ref):
    y = jnp.dot(x_ref[...], w_ref[...], preferred_element_type=jnp.float32)
    y_ref[...] = y
    s_sum = jnp.sum(y, axis=0, keepdims=True)
    s_sq = jnp.sum(y * y, axis=0, keepdims=True)
    st_ref[...] = jnp.concatenate([s_sum, s_sq], axis=0)[None]


# ------------------ pass 2: BN1+ReLU, conv2 (3x3/stride/pad=1) ----------------
def _make_conv2_kernel(H, W, Hout, Wout, Pp, s, OT, OL, HP, WP):
    HW = Hout * Wout

    def kernel(y1_ref, sc_ref, sh_ref, w2_ref, y2_ref, st_ref, pad_ref):
        # Zero only the halo strips each step (interior is fully overwritten);
        # done per-step so it is correct under any grid->core split.
        if OT > 0:
            pad_ref[0:OT, :, :] = jnp.zeros((OT, WP, Pp), jnp.float32)
        if HP - (OT + H) > 0:
            pad_ref[OT + H:HP, :, :] = jnp.zeros((HP - OT - H, WP, Pp), jnp.float32)
        if OL > 0:
            pad_ref[:, 0:OL, :] = jnp.zeros((HP, OL, Pp), jnp.float32)
        if WP - (OL + W) > 0:
            pad_ref[:, OL + W:WP, :] = jnp.zeros((HP, WP - OL - W, Pp), jnp.float32)

        # BN1 scale/shift + ReLU, then stage into the padded scratch.
        z = jnp.maximum(y1_ref[0] * sc_ref[...] + sh_ref[...], 0.0)   # (H*W, Pp)
        pad_ref[OT:OT + H, OL:OL + W, :] = z.reshape(H, W, Pp)

        if s == 1:
            def tap(kh, kw):
                h0, w0 = OT + kh - 1, OL + kw - 1
                return pad_ref[h0:h0 + Hout, w0:w0 + Wout, :]
        else:
            padv = pad_ref[...]
            phases = {(a, b): padv[a::s, b::s, :]
                      for a in range(s) for b in range(s)}

            def tap(kh, kw):
                h0, w0 = OT + kh - 1, OL + kw - 1
                ph = phases[(h0 % s, w0 % s)]
                return ph[h0 // s:h0 // s + Hout, w0 // s:w0 // s + Wout, :]

        # 9 per-tap bf16 matmuls accumulated in f32 (no im2col buffer).
        acc = jnp.zeros((HW, Pp), jnp.float32)
        for kh in range(3):
            for kw in range(3):
                t = tap(kh, kw).reshape(HW, Pp).astype(jnp.bfloat16)
                acc = acc + jnp.dot(t, w2_ref[kh * 3 + kw],
                                    preferred_element_type=jnp.float32)

        y2_ref[0] = acc
        s_sum = jnp.sum(acc, axis=0, keepdims=True)
        s_sq = jnp.sum(acc * acc, axis=0, keepdims=True)
        st_ref[...] = jnp.concatenate([s_sum, s_sq], axis=0)[None]

    return kernel


# ------------------ pass 3: BN2+ReLU, conv3 (1x1), shortcut proj --------------
def _make_conv3_kernel(rows_valid, tile_rows, has_proj):
    def kernel(*refs):
        if has_proj:
            (y2_ref, sc_ref, sh_ref, w3_ref, xs_ref, ws_ref,
             y3_ref, st3_ref, ys_ref, sts_ref) = refs
        else:
            y2_ref, sc_ref, sh_ref, w3_ref, y3_ref, st3_ref = refs

        # Mask zero-padded rows so BN2's shift does not pollute BN3 statistics.
        rid = (pl.program_id(0) * tile_rows
               + lax.broadcasted_iota(jnp.int32, (tile_rows, 1), 0))
        mask = (rid < rows_valid).astype(jnp.float32)

        z2 = jnp.maximum(y2_ref[...] * sc_ref[...] + sh_ref[...], 0.0) * mask
        y3 = jnp.dot(z2.astype(jnp.bfloat16), w3_ref[...],
                     preferred_element_type=jnp.float32)
        y3_ref[...] = y3
        st3_ref[...] = jnp.concatenate(
            [jnp.sum(y3, axis=0, keepdims=True),
             jnp.sum(y3 * y3, axis=0, keepdims=True)], axis=0)[None]

        if has_proj:
            ys = jnp.dot(xs_ref[...], ws_ref[...],
                         preferred_element_type=jnp.float32)
            ys_ref[...] = ys
            sts_ref[...] = jnp.concatenate(
                [jnp.sum(ys, axis=0, keepdims=True),
                 jnp.sum(ys * ys, axis=0, keepdims=True)], axis=0)[None]

    return kernel


# ------------------ pass 4: BN3 (+BN_s), residual add, ReLU -------------------
def _out_kernel(y3_ref, s3_ref, b3_ref, r_ref, sr_ref, br_ref, o_ref):
    main = y3_ref[...] * s3_ref[...] + b3_ref[...]
    res = r_ref[...] * sr_ref[...] + br_ref[...]
    o_ref[...] = jnp.maximum(main + res, 0.0)


# ------------------------------- wrapper --------------------------------------
def bottleneck_block(x_nchw, params, stride):
    """Pallas forward.  x_nchw: (N, Cin, H, W) -> (N, 4*planes, Hout, Wout)."""
    N, Cin, H, W = x_nchw.shape
    P = params["w1"].shape[1]
    Cout = EXPANSION * P
    has_proj = "ws" in params
    s = stride
    Hout = (H - 1) // s + 1
    Wout = (W - 1) // s + 1
    R1 = N * H * W
    R = N * Hout * Wout

    Cp = _round_up(Cin, LANE)
    Pp = _round_up(P, LANE)
    Coutp = _round_up(Cout, LANE)

    # ---- layout prep (XLA side): NHWC, zero-padded channels, bf16 weights.
    x_nhwc = jnp.transpose(x_nchw, (0, 2, 3, 1)).astype(jnp.float32)
    x_nhwc = jnp.pad(x_nhwc, ((0, 0), (0, 0), (0, 0), (0, Cp - Cin)))

    def pad_w(w, r, c):
        return jnp.pad(w, ((0, r - w.shape[0]),
                           (0, c - w.shape[1]))).astype(jnp.bfloat16)

    def pad_bn(v, c):
        return jnp.pad(v, ((0, 0), (0, c - v.shape[1]))).astype(jnp.float32)

    w1 = pad_w(params["w1"], Cp, Pp)
    w2 = jnp.pad(params["w2"], ((0, 0), (0, 0), (0, Pp - P), (0, Pp - P)))
    w2 = w2.reshape(9, Pp, Pp).astype(jnp.bfloat16)        # tap-major (kh*3+kw)
    w3 = pad_w(params["w3"], Pp, Coutp)
    g1, b1 = pad_bn(params["g1"], Pp), pad_bn(params["b1"], Pp)
    g2, b2 = pad_bn(params["g2"], Pp), pad_bn(params["b2"], Pp)
    g3, b3 = pad_bn(params["g3"], Coutp), pad_bn(params["b3"], Coutp)

    # ============ pass 1: conv1 + BN1 partial stats (grid over rows) =========
    TR1, R1p, G1 = _row_tiling(R1)
    x2d = x_nhwc.reshape(R1, Cp)
    x2d = jnp.pad(x2d, ((0, R1p - R1), (0, 0))).astype(jnp.bfloat16)

    y1_flat, st1 = pl.pallas_call(
        _conv1_kernel,
        grid=(G1,),
        in_specs=[pl.BlockSpec((TR1, Cp), lambda i: (i, 0)),
                  pl.BlockSpec((Cp, Pp), lambda i: (0, 0))],
        out_specs=(pl.BlockSpec((TR1, Pp), lambda i: (i, 0)),
                   pl.BlockSpec((1, 2, Pp), lambda i: (i, 0, 0))),
        out_shape=(jax.ShapeDtypeStruct((R1p, Pp), jnp.float32),
                   jax.ShapeDtypeStruct((G1, 2, Pp), jnp.float32)),
        compiler_params=_cparams(TR1 * Cp * 2 + Cp * Pp * 2 + TR1 * Pp * 4),
    )(x2d, w1)
    scale1, shift1 = _finalize_bn(st1, R1, g1, b1)

    # ============ pass 2: BN1+ReLU, 3x3 conv, BN2 partial stats (grid over N) =
    OT = 1                                              # top halo row
    OL = 8                                              # left halo (sublane aligned)
    HP = max(OT + H, OT + (Hout - 1) * s + 2)
    WP = _round_up(max(OL + W, OL + (Wout - 1) * s + 2), SUB)
    y1_img = y1_flat[:R1].reshape(N, H * W, Pp)

    y2_img, st2 = pl.pallas_call(
        _make_conv2_kernel(H, W, Hout, Wout, Pp, s, OT, OL, HP, WP),
        grid=(N,),
        in_specs=[pl.BlockSpec((1, H * W, Pp), lambda n: (n, 0, 0)),
                  pl.BlockSpec((1, Pp), lambda n: (0, 0)),
                  pl.BlockSpec((1, Pp), lambda n: (0, 0)),
                  pl.BlockSpec((9, Pp, Pp), lambda n: (0, 0, 0))],
        out_specs=(pl.BlockSpec((1, Hout * Wout, Pp), lambda n: (n, 0, 0)),
                   pl.BlockSpec((1, 2, Pp), lambda n: (n, 0, 0))),
        out_shape=(jax.ShapeDtypeStruct((N, Hout * Wout, Pp), jnp.float32),
                   jax.ShapeDtypeStruct((N, 2, Pp), jnp.float32)),
        scratch_shapes=[pltpu.VMEM((HP, WP, Pp), jnp.float32)],
        compiler_params=_cparams(H * W * Pp * 4 + HP * WP * Pp * 4
                                 + 9 * Pp * Pp * 2 + Hout * Wout * Pp * 4),
    )(y1_img, scale1, shift1, w2)
    scale2, shift2 = _finalize_bn(st2, R, g2, b2)

    # ============ pass 3: BN2+ReLU, conv3 (+shortcut proj), partial stats =====
    TR, Rp, G = _row_tiling(R)
    y2 = jnp.pad(y2_img.reshape(R, Pp), ((0, Rp - R), (0, 0)))
    x_s = x_nhwc[:, ::s, ::s, :].reshape(R, Cp)
    x_s = jnp.pad(x_s, ((0, Rp - R), (0, 0)))

    k3_in = [y2, scale2, shift2, w3]
    in_specs3 = [pl.BlockSpec((TR, Pp), lambda i: (i, 0)),
                 pl.BlockSpec((1, Pp), lambda i: (0, 0)),
                 pl.BlockSpec((1, Pp), lambda i: (0, 0)),
                 pl.BlockSpec((Pp, Coutp), lambda i: (0, 0))]
    out_specs3 = [pl.BlockSpec((TR, Coutp), lambda i: (i, 0)),
                  pl.BlockSpec((1, 2, Coutp), lambda i: (i, 0, 0))]
    out_shape3 = [jax.ShapeDtypeStruct((Rp, Coutp), jnp.float32),
                  jax.ShapeDtypeStruct((G, 2, Coutp), jnp.float32)]
    work3 = TR * Pp * 4 + Pp * Coutp * 2 + TR * Coutp * 4
    if has_proj:
        ws = pad_w(params["ws"], Cp, Coutp)
        gs, bs = pad_bn(params["gs"], Coutp), pad_bn(params["bs"], Coutp)
        k3_in += [x_s.astype(jnp.bfloat16), ws]
        in_specs3 += [pl.BlockSpec((TR, Cp), lambda i: (i, 0)),
                      pl.BlockSpec((Cp, Coutp), lambda i: (0, 0))]
        out_specs3 += [pl.BlockSpec((TR, Coutp), lambda i: (i, 0)),
                       pl.BlockSpec((1, 2, Coutp), lambda i: (i, 0, 0))]
        out_shape3 += [jax.ShapeDtypeStruct((Rp, Coutp), jnp.float32),
                       jax.ShapeDtypeStruct((G, 2, Coutp), jnp.float32)]
        work3 += TR * Cp * 2 + Cp * Coutp * 2 + TR * Coutp * 4

    k3_out = pl.pallas_call(
        _make_conv3_kernel(R, TR, has_proj),
        grid=(G,),
        in_specs=in_specs3,
        out_specs=tuple(out_specs3),
        out_shape=tuple(out_shape3),
        compiler_params=_cparams(work3),
    )(*k3_in)

    if has_proj:
        y3, st3, ys, sts = k3_out
        scale3, shift3 = _finalize_bn(st3, R, g3, b3)
        scale_r, shift_r = _finalize_bn(sts, R, gs, bs)
        res = ys
    else:
        y3, st3 = k3_out
        scale3, shift3 = _finalize_bn(st3, R, g3, b3)
        res = x_s                                   # identity (Cp == Coutp), f32
        scale_r = jnp.ones((1, Coutp), jnp.float32)
        shift_r = jnp.zeros((1, Coutp), jnp.float32)

    # ============ pass 4: BN3 (+BN_s), residual add, ReLU =====================
    out2d = pl.pallas_call(
        _out_kernel,
        grid=(G,),
        in_specs=[pl.BlockSpec((TR, Coutp), lambda i: (i, 0)),
                  pl.BlockSpec((1, Coutp), lambda i: (0, 0)),
                  pl.BlockSpec((1, Coutp), lambda i: (0, 0)),
                  pl.BlockSpec((TR, Coutp), lambda i: (i, 0)),
                  pl.BlockSpec((1, Coutp), lambda i: (0, 0)),
                  pl.BlockSpec((1, Coutp), lambda i: (0, 0))],
        out_specs=pl.BlockSpec((TR, Coutp), lambda i: (i, 0)),
        out_shape=jax.ShapeDtypeStruct((Rp, Coutp), jnp.float32),
        compiler_params=_cparams(3 * TR * Coutp * 4),
    )(y3, scale3, shift3, res, scale_r, shift_r)

    out = out2d[:R].reshape(N, Hout, Wout, Coutp)[..., :Cout]
    return jnp.transpose(out, (0, 3, 1, 2))           # back to NCHW


# ---------------- deterministic synthetic parameters --------------------------
def init_params(key, in_planes, planes, stride):
    cout = EXPANSION * planes
    ks = jax.random.split(key, 8)
    params = {
        "w1": jax.random.normal(ks[0], (in_planes, planes), jnp.float32) * 0.1,
        "g1": 1.0 + 0.1 * jax.random.normal(ks[1], (1, planes), jnp.float32),
        "b1": 0.1 * jax.random.normal(ks[2], (1, planes), jnp.float32),
        "w2": jax.random.normal(ks[3], (3, 3, planes, planes), jnp.float32) * 0.1,
        "g2": jnp.ones((1, planes), jnp.float32),
        "b2": jnp.zeros((1, planes), jnp.float32),
        "w3": jax.random.normal(ks[4], (planes, cout), jnp.float32) * 0.1,
        "g3": 1.0 + 0.1 * jax.random.normal(ks[5], (1, cout), jnp.float32),
        "b3": 0.1 * jax.random.normal(ks[6], (1, cout), jnp.float32),
    }
    if stride != 1 or in_planes != cout:
        params["ws"] = jax.random.normal(ks[7], (in_planes, cout), jnp.float32) * 0.1
        params["gs"] = jnp.ones((1, cout), jnp.float32)
        params["bs"] = jnp.zeros((1, cout), jnp.float32)
    return params


# ---------------- pure-JAX reference (NCHW, mirrors the PyTorch module) -------
def ref_forward(x, params, stride):
    def conv(y, w_oihw, s=1, pad=0):
        return lax.conv_general_dilated(
            y, w_oihw, (s, s), [(pad, pad), (pad, pad)],
            dimension_numbers=("NCHW", "OIHW", "NCHW"))

    def bn(y, g, b):
        mean = y.mean(axis=(0, 2, 3), keepdims=True)
        var = ((y - mean) ** 2).mean(axis=(0, 2, 3), keepdims=True)
        return ((y - mean) * lax.rsqrt(var + EPS)
                * g.reshape(1, -1, 1, 1) + b.reshape(1, -1, 1, 1))

    w1 = jnp.transpose(params["w1"], (1, 0))[:, :, None, None]
    w2 = jnp.transpose(params["w2"], (3, 2, 0, 1))
    w3 = jnp.transpose(params["w3"], (1, 0))[:, :, None, None]

    out = jax.nn.relu(bn(conv(x, w1), params["g1"], params["b1"]))
    out = jax.nn.relu(bn(conv(out, w2, s=stride, pad=1), params["g2"], params["b2"]))
    out = bn(conv(out, w3), params["g3"], params["b3"])
    if "ws" in params:
        ws = jnp.transpose(params["ws"], (1, 0))[:, :, None, None]
        sc = bn(conv(x, ws, s=stride), params["gs"], params["bs"])
    else:
        sc = x
    return jax.nn.relu(out + sc)


if __name__ == "__main__":
    # Small shapes consistent with the module: N=2, in_planes=4, planes=4,
    # stride=2, spatial 16x16 -> output (2, 16, 8, 8).
    N, in_planes, planes, stride, H, W = 2, 4, 4, 2, 16, 16

    key = jax.random.PRNGKey(0)
    kx, kp = jax.random.split(key)
    x = jax.random.normal(kx, (N, in_planes, H, W), jnp.float32)
    params = init_params(kp, in_planes, planes, stride)

    out = jax.block_until_ready(bottleneck_block(x, params, stride))
    ref = jax.block_until_ready(ref_forward(x, params, stride))

    assert out.shape == ref.shape, (out.shape, ref.shape)
    max_err = float(jnp.max(jnp.abs(out - ref)))
    # bf16 MXU operands (f32 accumulation) vs. the all-f32 XLA reference.
    assert jnp.allclose(out, ref, rtol=5e-2, atol=5e-2), max_err
    print("KERNEL_OK")
</pallas_src>

<mosaic_0001>
module attributes {stable_mosaic.version = 11 : i64} {
  func.func @_conv1_kernel(%arg0: i32, %arg1: memref<256x128xbf16, #tpu.memory_space<vmem>>, %arg2: memref<128x128xbf16, #tpu.memory_space<vmem>>, %arg3: memref<256x128xf32, #tpu.memory_space<vmem>>, %arg4: memref<1x2x128xf32, #tpu.memory_space<vmem>>) attributes {dimension_semantics = [#tpu.dimension_semantics<parallel>], iteration_bounds = array<i64: 2>, scalar_prefetch = 0 : i64, scratch_operands = 0 : i64, tpu.core_type = #tpu.core_type<tc>, window_params = [{transform_indices = @transform_0, window_bounds = array<i64: 256, 128>}, {pipeline_mode = #tpu.pipeline_mode<synchronous>, transform_indices = @transform_1, window_bounds = array<i64: 128, 128>}, {transform_indices = @transform_2, window_bounds = array<i64: 256, 128>}, {transform_indices = @transform_3, window_bounds = array<i64: 1, 2, 128>}]} {
    %c0 = arith.constant 0 : index
    %c0_0 = arith.constant 0 : index
    %0 = vector.load %arg1[%c0, %c0_0] : memref<256x128xbf16, #tpu.memory_space<vmem>>, vector<256x128xbf16>
    %c0_1 = arith.constant 0 : index
    %c0_2 = arith.constant 0 : index
    %1 = vector.load %arg2[%c0_1, %c0_2] : memref<128x128xbf16, #tpu.memory_space<vmem>>, vector<128x128xbf16>
    %cst = arith.constant dense<0.000000e+00> : vector<256x128xf32>
    %2 = tpu.matmul %0, %1, %cst {dimension_numbers = #tpu.dot_dimension_numbers<[1], [0], [0], [1], [0, 0, 1, 1], [], []>} : vector<256x128xbf16>, vector<128x128xbf16>, vector<256x128xf32> -> vector<256x128xf32>
    %c0_3 = arith.constant 0 : index
    %c0_4 = arith.constant 0 : index
    %3 = vector.load %arg3[%c0_3, %c0_4] : memref<256x128xf32, #tpu.memory_space<vmem>>, vector<256x128xf32>
    tpu.vector_store %arg3[%c0_3, %c0_4], %2 {strides = array<i32>} : memref<256x128xf32, #tpu.memory_space<vmem>>, vector<256x128xf32>,
    %cst_5 = arith.constant dense<0.000000e+00> : vector<128xf32>
    %4 = vector.multi_reduction <add>, %2, %cst_5 [0] : vector<256x128xf32> to vector<128xf32>
    %5 = vector.shape_cast %4 : vector<128xf32> to vector<1x128xf32>
    %6 = arith.mulf %2, %2 : vector<256x128xf32>
    %cst_6 = arith.constant dense<0.000000e+00> : vector<128xf32>
    %7 = vector.multi_reduction <add>, %6, %cst_6 [0] : vector<256x128xf32> to vector<128xf32>
    %8 = vector.shape_cast %7 : vector<128xf32> to vector<1x128xf32>
    %9 = tpu.concatenate %5, %8 in 0 : vector<1x128xf32>, vector<1x128xf32> -> vector<2x128xf32>
    %10 = vector.shape_cast %9 : vector<2x128xf32> to vector<1x2x128xf32>
    %c0_7 = arith.constant 0 : index
    %c0_8 = arith.constant 0 : index
    %c0_9 = arith.constant 0 : index
    %11 = vector.load %arg4[%c0_7, %c0_8, %c0_9] : memref<1x2x128xf32, #tpu.memory_space<vmem>>, vector<1x2x128xf32>
    tpu.vector_store %arg4[%c0_7, %c0_8, %c0_9], %10 {strides = array<i32>} : memref<1x2x128xf32, #tpu.memory_space<vmem>>, vector<1x2x128xf32>,
    return
  }
  func.func @transform_0(%arg0: i32) -> (i32, i32) {
    %c0_i32 = arith.constant 0 : i32
    %c0_i32_0 = arith.constant 0 : i32
    return %arg0, %c0_i32 : i32, i32
  }
  func.func @transform_1(%arg0: i32) -> (i32, i32) {
    %c0_i32 = arith.constant 0 : i32
    %c0_i32_0 = arith.constant 0 : i32
    %c0_i32_1 = arith.constant 0 : i32
    return %c0_i32, %c0_i32_0 : i32, i32
  }
  func.func @transform_2(%arg0: i32) -> (i32, i32) {
    %c0_i32 = arith.constant 0 : i32
    %c0_i32_0 = arith.constant 0 : i32
    return %arg0, %c0_i32 : i32, i32
  }
  func.func @transform_3(%arg0: i32) -> (i32, i32, i32) {
    %c0_i32 = arith.constant 0 : i32
    %c0_i32_0 = arith.constant 0 : i32
    %c0_i32_1 = arith.constant 0 : i32
    return %arg0, %c0_i32, %c0_i32_0 : i32, i32, i32
  }
}

</mosaic_0001>

<bundles_post_ra>
// kernel: tpu_custom_call.1
= control target key start
LH: loop header
LB: loop body
LE: loop exit
PB: predicated region body
PF: predicated region fallthrough
CT: control target
= control target key end

     0   :  { %9 = vsyncpa [#allocation3], 0  ;;  %s1621_s0 = inlined_call_operand.hbm [shape: bf16[512,128], index: 0, kind: input, shape index: {}]   ;;  %s1622_s1 = inlined_call_operand.hbm [shape: bf16[128,128], index: 1, kind: input, shape index: {}]   ;;  %s1623_s2 = inlined_call_operand.hbm [shape: f32[512,128], index: 2, kind: output, shape index: {0}]   ;;  %s1624_s3 = inlined_call_operand.hbm [shape: f32[2,2,128], index: 3, kind: output, shape index: {1}]  }
   0x1   :  { %11 = vsyncpa [#allocation3 + $0x1], 0 }
   0x2   :  { %12 = vsyncpa [#allocation6], 0 }
   0x3   :  { %13 = vsyncpa [#allocation4], 0 }
   0x4   :  { %15 = vsyncpa [#allocation4 + $0x1], 0 }
   0x5   :  { %16 = vsyncpa [#allocation9], 0 }
   0x6   :  { %18 = vsyncpa [#allocation9 + $0x1], 0  ;;  %s1264_s12 = smov 0   ;;  %s1266_s13 = smov 0  }
   0x7   :  { %s1268_s14 = smov 0   ;;  %s1270_s15 = smov 0  }
   0x8 LB: > { %s1285_s16 = sadd.s32 4294967295, %s1234_s15   ;;  %s859_s17 = sadd.s32 4294967294, %s1234_s15   ;;  %s1234_s15 = sphi %s1270_s15, %s1646_s15   ;;  %s1230_s14 = sphi %s1268_s14, %s1645_s14   ;;  %s1226_s13 = sphi %s1266_s13, %s1644_s13   ;;  %s1222_s12 = sphi %s1264_s12, %s1643_s12  }
   0x9   : > { %p44_p0 = scmp.ne.s32.totalorder %s1226_s13, %s1222_s12  ;;  %p1625_p1 = scmp.eq.s32.totalorder %s1285_s16, 0 }
   0xa   : > { %p95_p3 = scmp.eq.s32.totalorder %s859_s17, 1  ;;  %p860_p5 = scmp.ge.s32.totalorder %s1234_s15, 1 }
   0xb   : > { %p1294_p4 = por %p1625_p1, %p44_p0  ;;  %p128_p7 = scmp.lt.s32.totalorder %s1234_s15, 3 }
   0xc   : > { %p1299_p6 = por %p95_p3, %p44_p0  ;;  %s1236_s21 = smov [#allocation5]  }
   0xd   : > { %s1629_s18 = scalar_select %p1294_p4, 1, 0 }
   0xe   : > { %s1630_s19 = scalar_select %p1299_p6, 1, 0 }
   0xf   : > { %p1304_p8 = pnand %p860_p5, %p128_p7  ;;  %s140_s22 = sshll.u32 %s1236_s21, 4  ;;  %s141_s22 = int_to_ptr.vmem [resolvable:$true] %s140_s22 }
  0x10   : > { %s1318_s24 = sadd.s32 1, %s1234_s15   ;;  %s31_s25 = sadd.s32 1, %s1230_s14 }
  0x11   : > { %s1631_s20 = scalar_select %p1304_p8, 1, 0 }
  0x12   : > { %p1002_p9 = pneg %p1304_p8  ;;  %s28_s26 = ssub.s32 %s1234_s15, %s1318_s24 }
  0x13   : > { %s1093_s27 = scalar_lea.vmem %s141_s22, 1024  ;;  %p1101_p5 = scmp.lt.s32.totalorder %s141_s22, %s141_s22 }
  0x14   : > { %p1313_p11 = pnand %p1002_p9, %p1625_p1  ;;  %p1094_p13 = scmp.ne.s32.totalorder %s141_s22, %s1093_s27 }
  0x15   : > { %p1102_p7 = scmp.lt.s32.totalorder %s1093_s27, %s1093_s27 }
  0x16   : > { %p1084_p12 = pneg %p1313_p11 }
  0x17   : > { %p1103_p10 = por %p1102_p7, %p1101_p5 }
  0x18   : > { %p1096_p0 = pnand %p1094_p13, %p1084_p12 }
  0x1a   : > { %p1097_p3 = pneg %p1096_p0 }
  0x1c   : > { %p1104_p2 = pnand %p1103_p10, %p1097_p3 }
  0x1e   : > { %1107 = shalt.err (!%p1104_p2)
}
  0x1f   : > { %s1237_s28 = smov 64   ;;  %s1238_s29 = smov 4  }
  0x20   : > { %1005 = dma.hbm_to_vmem [thread:$0]  (!%p1313_p11), %s1622_s1, 1024, %s141_s22, [#allocation6], %s1237_s28, %s1237_s28, %s1238_s29  }
  0x21   : > { %p29_p2 = scmp.eq.s32.totalorder %s28_s26, 0  ;;  %p38_p9 = scmp.ne.s32.totalorder %s1230_s14, %s1226_s13 }
  0x22   : > { %p39_p10 = scmp.eq.s32.totalorder %s1234_s15, 0  ;;  %p1018_p12 = scmp.lt.s32.totalorder %s1234_s15, 2 }
  0x23   : > { %s1338_s5 = scalar_select %p29_p2, %s1230_s14, %s31_s25  }
  0x24   : > { %p40_p13 = por %p39_p10, %p38_p9  ;;  %p1633_p0 = scmp.eq.s32.totalorder %s1285_s16, 1 }
  0x25   : > { %s154_s7 = sand.u32 1, %s1230_s14   ;;  %s902_s8 = sshll.u32 %s1234_s15, 11 }
  0x26   : > { %p1342_p3 = por %p1633_p0, %p38_p9  ;;  %s863_s9 = sshll.u32 %s154_s7, 7 }
  0x27   : > { %s1351_s17 = scalar_lea.hbm %s1621_s0, %s902_s8  ;;  %s158_s21 = scalar_lea.vmem [#allocation2], %s863_s9 }
  0x28   : > { %s1634_s6 = scalar_select %p1342_p3, 1, 0 }
  0x29   : > { %s165_s22 = sshll.u32 %s158_s21, 4  ;;  %p1353_p11 = pnand %p1018_p12, %p40_p13  ;;  %s1357_s22 = int_to_ptr.vmem [resolvable:$true] %s165_s22 }
  0x2a   : > { %s1359_s25 = scalar_lea.sflag [#allocation3], %s154_s7  ;;  %s1108_s26 = scalar_lea.hbm %s1351_s17, 2048 }
  0x2b   : > { %p1109_p5 = scmp.ne.s32.totalorder %s1351_s17, %s1108_s26  ;;  %p1110_p7 = pneg %p1353_p11 }
  0x2c   : > { %s1113_s4 = scalar_lea.hbm %s1621_s0, 4096  ;;  %p1114_p10 = scmp.lt.s32.totalorder %s1351_s17, %s1621_s0 }
  0x2d   : > { %p1111_p2 = pnand %p1110_p7, %p1109_p5  ;;  %p1115_p12 = scmp.lt.s32.totalorder %s1113_s4, %s1108_s26 }
  0x2f   : > { %p1112_p9 = pneg %p1111_p2  ;;  %p1116_p13 = por %p1115_p12, %p1114_p10 }
  0x31   : > { %p1117_p0 = pnand %p1116_p13, %p1112_p9 }
  0x33   : > { %1120 = shalt.err (!%p1117_p0)
}
  0x34   : > { %s1121_s7 = scalar_lea.vmem %s1357_s22, 2048  ;;  %s1239_s10 = smov [#allocation2]  }
  0x35   : > { %p1122_p1 = scmp.ne.s32.totalorder %s1357_s22, %s1121_s7  ;;  %s1126_s11 = sshll.u32 %s1239_s10, 4  ;;  %s1127_s11 = int_to_ptr.vmem [resolvable:$false] %s1126_s11 }
  0x36   : > { %s1128_s21 = scalar_lea.vmem %s1127_s11, 4096  ;;  %p1129_p2 = scmp.lt.s32.totalorder %s1357_s22, %s1127_s11 }
  0x37   : > { %p1124_p6 = pnand %p1122_p1, %p1110_p7  ;;  %p1130_p3 = scmp.lt.s32.totalorder %s1128_s21, %s1121_s7 }
  0x39   : > { %p1125_p5 = pneg %p1124_p6  ;;  %p1131_p4 = por %p1130_p3, %p1129_p2 }
  0x3b   : > { %p1132_p8 = pnand %p1131_p4, %p1125_p5 }
  0x3d   : > { %1135 = shalt.err (!%p1132_p8)
}
  0x3e   : > { %1009 = dma.hbm_to_vmem [thread:$0]  (!%p1353_p11), %s1351_s17, 2048, %s1357_s22, %s1359_s25, %s1237_s28, %s1237_s28, %s1238_s29  }
  0x3f   : > { %p1636_p1 = scmp.ne.s32.totalorder %s1631_s20, 0 }
  0x40   : > { %s1386_s26 = sand.u32 (!%p1636_p1), 1, %s1226_s13   ;;  %p1637_p4 = scmp.ne.s32.totalorder (!%p1636_p1), %s1629_s18, 0 }
  0x41   : > { %177 = sbr.rel (%p1636_p1) target bundleno = 406 (0x196), region = 28  ;;  %s867_s27 = sshll.u32 (!%p1636_p1), %s1386_s26, 7 }
  0x42   : > { %s180_s30 = scalar_lea.sflag (!%p1636_p1), [#allocation3], %s1386_s26  ;;  %s1390_s4 = scalar_lea.vmem (!%p1636_p1), [#allocation2], %s867_s27 }
  0x46   : > { %1205 = dma.done.wait (%p1637_p4), %s180_s30, 2048  }
  0x47   : > { %1207 = vsyncadd (%p1637_p4), %s180_s30, 4294965248  ;;  %p1638_p6 = scmp.eq.s32.totalorder %s1285_s16, 0 }
  0x49   : > { %1209 = dma.done.wait (%p1638_p6), [#allocation6], 1024   ;;  %p1639_p8 = pmov %p1638_p6 }
  0x4a   : > { %v1058_v0 = vld [vmem:[#allocation5 + $0x38] sm:$0xff]   ;;  %v1059_v1 = vld [vmem:[#allocation5 + $0x30] sm:$0xff]   ;;  %v1060_v2 = vld [vmem:[#allocation5 + $0x28] sm:$0xff]   ;;  %s869_s18 = sshll.u32 %s1386_s26, 8  ;;  %s903_s28 = sshll.u32 %s1285_s16, 12 }
  0x4b   : > { %1211 = vsyncadd (%p1639_p8), [#allocation6], 4294966272  ;;  %928 = vmatprep.subr.bf16.mxu0 %v1058_v0  ;;  %976 = vmatprep.subr.bf16.mxu1 %v1058_v0  ;;  %v1061_v3 = vld [vmem:[#allocation5 + $0x20] sm:$0xff]   ;;  %v1062_v5 = vld [vmem:[#allocation5 + $0x18] sm:$0xff]   ;;  %s1419_s20 = scalar_lea.vmem [#allocation7], %s869_s18  ;;  %s1496_s23 = scalar_lea.hbm %s1623_s2, %s903_s28 }
  0x4c   : > { %929 = vmatpush3.bf16.msra.mxu0 %v1058_v0  ;;  %984 = vmatpush3.bf16.msra.mxu1 %v1058_v0  ;;  %v1066_v4 = vld [vmem:[%s1390_s4] sm:$0xff]   ;;  %v1063_v6 = vld [vmem:[#allocation5 + $0x10] sm:$0xff]   ;;  %v1064_v8 = vld [vmem:[#allocation5 + $0x8] sm:$0xff]   ;;  %s731_s29 = sshll.u32 %s1419_s20, 4  ;;  %s713_s25 = scalar_lea.sflag [#allocation4], %s1386_s26  ;;  %s1498_s29 = int_to_ptr.vmem [resolvable:$true] %s731_s29 }
  0x4d   : > { %930 = vmatprep.subr.bf16.mxu0 %v1059_v1  ;;  %977 = vmatprep.subr.bf16.mxu1 %v1059_v1  ;;  %v1074_v7 = vld [vmem:[%s1390_s4 + $0x40] sm:$0xff]   ;;  %v1067_v10 = vld [vmem:[%s1390_s4 + $0x8] sm:$0xff]   ;;  %v1068_v12 = vld [vmem:[%s1390_s4 + $0x10] sm:$0xff]   ;;  %s1136_s8 = scalar_lea.vmem %s1498_s29, 4096  ;;  %p1640_p11 = scmp.ne.s32.totalorder %s1634_s6, 0 }
  0x4e   : > { %944 = vmatprep.mubr.bf16.mxu0 %v1066_v4  ;;  %960 = vmatprep.mubr.bf16.mxu1 %v1074_v7  ;;  %v1065_v9 = vld [vmem:[#allocation5] sm:$0xff]   ;;  %v1075_v11 = vld [vmem:[%s1390_s4 + $0x48] sm:$0xff]   ;;  %v1076_v13 = vld [vmem:[%s1390_s4 + $0x50] sm:$0xff]   ;;  %p1137_p3 = scmp.ne.s32.totalorder %s1498_s29, %s1136_s8  ;;  %s1240_s9 = smov [#allocation7]  }
  0x4f   : > { %v1069_v14 = vld [vmem:[%s1390_s4 + $0x18] sm:$0xff]   ;;  %v1070_v16 = vld [vmem:[%s1390_s4 + $0x20] sm:$0xff]   ;;  %v1071_v18 = vld [vmem:[%s1390_s4 + $0x28] sm:$0xff]   ;;  %s1140_s7 = sshll.u32 %s1240_s9, 4  ;;  %s1141_s7 = int_to_ptr.vmem [resolvable:$false] %s1140_s7 }
  0x50   : > { %931 = vmatpush3.bf16.msra.mxu0 %v1059_v1  ;;  %985 = vmatpush3.bf16.msra.mxu1 %v1059_v1  ;;  %v1077_v15 = vld [vmem:[%s1390_s4 + $0x58] sm:$0xff]   ;;  %v1078_v17 = vld [vmem:[%s1390_s4 + $0x60] sm:$0xff]   ;;  %v1079_v19 = vld [vmem:[%s1390_s4 + $0x68] sm:$0xff]   ;;  %p1138_p7 = pnand %p1137_p3, %p1640_p11  ;;  %s1142_s10 = scalar_lea.vmem %s1141_s7, 8192 }
  0x51   : > { %932 = vmatprep.subr.bf16.mxu0 %v1060_v2  ;;  %978 = vmatprep.subr.bf16.mxu1 %v1060_v2  ;;  %v1072_v20 = vld [vmem:[%s1390_s4 + $0x30] sm:$0xff]   ;;  %v1073_v22 = vld [vmem:[%s1390_s4 + $0x38] sm:$0xff]   ;;  %p1143_p10 = scmp.lt.s32.totalorder %s1498_s29, %s1141_s7  ;;  %p1144_p12 = scmp.lt.s32.totalorder %s1142_s10, %s1136_s8 }
  0x52   : > { %v1080_v21 = vld [vmem:[%s1390_s4 + $0x70] sm:$0xff]   ;;  %v1081_v23 = vld [vmem:[%s1390_s4 + $0x78] sm:$0xff]   ;;  %p1139_p9 = pneg %p1138_p7 }
  0x53   : > { %p1145_p13 = por %p1144_p12, %p1143_p10 }
  0x54   : > { %933 = vmatpush3.bf16.msra.mxu0 %v1060_v2  ;;  %986 = vmatpush3.bf16.msra.mxu1 %v1060_v2 }
  0x55   : > { %934 = vmatprep.subr.bf16.mxu0 %v1061_v3  ;;  %979 = vmatprep.subr.bf16.mxu1 %v1061_v3  ;;  %p1146_p0 = pnand %p1145_p13, %p1139_p9 }
  0x58   : > { %935 = vmatpush3.bf16.msra.mxu0 %v1061_v3  ;;  %987 = vmatpush3.bf16.msra.mxu1 %v1061_v3 }
  0x59   : > { %936 = vmatprep.subr.bf16.mxu0 %v1062_v5  ;;  %980 = vmatprep.subr.bf16.mxu1 %v1062_v5 }
  0x5c   : > { %937 = vmatpush3.bf16.msra.mxu0 %v1062_v5  ;;  %988 = vmatpush3.bf16.msra.mxu1 %v1062_v5 }
  0x5d   : > { %938 = vmatprep.subr.bf16.mxu0 %v1063_v6  ;;  %981 = vmatprep.subr.bf16.mxu1 %v1063_v6 }
  0x60   : > { %939 = vmatpush3.bf16.msra.mxu0 %v1063_v6  ;;  %989 = vmatpush3.bf16.msra.mxu1 %v1063_v6 }
  0x61   : > { %940 = vmatprep.subr.bf16.mxu0 %v1064_v8  ;;  %982 = vmatprep.subr.bf16.mxu1 %v1064_v8 }
  0x64   : > { %941 = vmatpush3.bf16.msra.mxu0 %v1064_v8  ;;  %990 = vmatpush3.bf16.msra.mxu1 %v1064_v8 }
  0x65   : > { %942 = vmatprep.subr.bf16.mxu0 %v1065_v9  ;;  %983 = vmatprep.subr.bf16.mxu1 %v1065_v9 }
  0x68   : > { %943 = vmatpush3.bf16.msra.mxu0 %v1065_v9  ;;  %991 = vmatpush3.bf16.msra.mxu1 %v1065_v9 }
  0x6b   : > { %945 = vmatmul.mubr.bf16.vlgmr.msra.gmra.mxu0 %v1067_v10  ;;  %961 = vmatmul.mubr.bf16.vlgmr.msra.gmra.mxu1 %v1075_v11 }
  0x6c   : > { %948 = vmatprep.mubr.bf16.mxu0 %v1068_v12  ;;  %964 = vmatprep.mubr.bf16.mxu1 %v1076_v13 }
  0x73   : > { %949 = vmatmul.mubr.bf16.gmra.mxu0 %v1069_v14  ;;  %965 = vmatmul.mubr.bf16.gmra.mxu1 %v1077_v15 }
  0x74   : > { %952 = vmatprep.mubr.bf16.mxu0 %v1070_v16  ;;  %968 = vmatprep.mubr.bf16.mxu1 %v1078_v17 }
  0x7b   : > { %953 = vmatmul.mubr.bf16.gmra.mxu0 %v1071_v18  ;;  %969 = vmatmul.mubr.bf16.gmra.mxu1 %v1079_v19 }
  0x7c   : > { %956 = vmatprep.mubr.bf16.mxu0 %v1072_v20  ;;  %972 = vmatprep.mubr.bf16.mxu1 %v1080_v21 }
  0x83   : > { %957 = vmatmul.mubr.bf16.gmra.mxu0 %v1073_v22  ;;  %973 = vmatmul.mubr.bf16.gmra.mxu1 %v1081_v23 }
 0x12b   : > { %v946_v24 = vpop.f32.mrf.mxu0  ;;  %v1417_v25 = vpop.f32.mrf.mxu1 }
 0x12c   : > { %573 = vst [vmem:[%s1419_s20 + $0x10] sm:$0xff] %v946_v24  ;;  %589 = vst [vmem:[%s1419_s20 + $0x90] sm:$0xff] %v1417_v25  ;;  %v642_v37 = vmul.f32 %v946_v24, %v946_v24 }
 0x12d   : > { %v444_v26 = vpop.f32.mrf.mxu0  ;;  %v1424_v27 = vpop.f32.mrf.mxu1 }
 0x12e   : > { %571 = vst [vmem:[%s1419_s20] sm:$0xff] %v444_v26  ;;  %587 = vst [vmem:[%s1419_s20 + $0x80] sm:$0xff] %v1424_v27  ;;  %v640_v32 = vmul.f32 %v444_v26, %v444_v26 }
 0x12f   : > { %v947_v28 = vpop.f32.mrf.mxu0  ;;  %v1429_v29 = vpop.f32.mrf.mxu1 }
 0x130   : > { %574 = vst [vmem:[%s1419_s20 + $0x18] sm:$0xff] %v947_v28  ;;  %590 = vst [vmem:[%s1419_s20 + $0x98] sm:$0xff] %v1429_v29  ;;  %v643_v42 = vmul.f32 %v947_v28, %v947_v28 }
 0x131   : > { %v447_v30 = vpop.f32.mrf.mxu0  ;;  %v1434_v31 = vpop.f32.mrf.mxu1 }
 0x132   : > { %572 = vst [vmem:[%s1419_s20 + $0x8] sm:$0xff] %v447_v30  ;;  %v603_v33 = vadd.f32 %v447_v30, %v444_v26  ;;  %v641_v34 = vmul.f32 %v447_v30, %v447_v30  ;;  %588 = vst [vmem:[%s1419_s20 + $0x88] sm:$0xff] %v1434_v31 }
 0x133   : > { %v950_v35 = vpop.f32.mrf.mxu0  ;;  %v1439_v36 = vpop.f32.mrf.mxu1 }
 0x134   : > { %v604_v38 = vadd.f32 %v946_v24, %v603_v33  ;;  %v672_v39 = vadd.f32 %v641_v34, %v640_v32  ;;  %577 = vst [vmem:[%s1419_s20 + $0x30] sm:$0xff] %v950_v35  ;;  %593 = vst [vmem:[%s1419_s20 + $0xb0] sm:$0xff] %v1439_v36  ;;  %v646_v57 = vmul.f32 %v950_v35, %v950_v35 }
 0x135   : > { %v460_v40 = vpop.f32.mrf.mxu0  ;;  %v1444_v41 = vpop.f32.mrf.mxu1 }
 0x136   : > { %v673_v43 = vadd.f32 %v672_v39, %v642_v37  ;;  %575 = vst [vmem:[%s1419_s20 + $0x20] sm:$0xff] %v460_v40  ;;  %v605_v44 = vadd.f32 %v947_v28, %v604_v38  ;;  %591 = vst [vmem:[%s1419_s20 + $0xa0] sm:$0xff] %v1444_v41  ;;  %v644_v48 = vmul.f32 %v460_v40, %v460_v40 }
 0x137   : > { %v951_v45 = vpop.f32.mrf.mxu0  ;;  %v1449_v46 = vpop.f32.mrf.mxu1 }
 0x138   : > { %v606_v47 = vadd.f32 %v605_v44, %v460_v40  ;;  %v674_v49 = vadd.f32 %v673_v43, %v643_v42  ;;  %578 = vst [vmem:[%s1419_s20 + $0x38] sm:$0xff] %v951_v45  ;;  %594 = vst [vmem:[%s1419_s20 + $0xb8] sm:$0xff] %v1449_v46  ;;  %v647_v62 = vmul.f32 %v951_v45, %v951_v45 }
 0x139   : > { %v463_v50 = vpop.f32.mrf.mxu0  ;;  %v1454_v51 = vpop.f32.mrf.mxu1 }
 0x13a   : > { %v675_v52 = vadd.f32 %v674_v49, %v644_v48  ;;  %576 = vst [vmem:[%s1419_s20 + $0x28] sm:$0xff] %v463_v50  ;;  %v607_v53 = vadd.f32 %v606_v47, %v463_v50  ;;  %v645_v54 = vmul.f32 %v463_v50, %v463_v50  ;;  %592 = vst [vmem:[%s1419_s20 + $0xa8] sm:$0xff] %v1454_v51 }
 0x13b   : > { %v954_v55 = vpop.f32.mrf.mxu0  ;;  %v1459_v56 = vpop.f32.mrf.mxu1 }
 0x13c   : > { %v608_v58 = vadd.f32 %v950_v35, %v607_v53  ;;  %v676_v59 = vadd.f32 %v675_v52, %v645_v54  ;;  %581 = vst [vmem:[%s1419_s20 + $0x50] sm:$0xff] %v954_v55  ;;  %597 = vst [vmem:[%s1419_s20 + $0xd0] sm:$0xff] %v1459_v56  ;;  %v650_v13 = vmul.f32 %v954_v55, %v954_v55 }
 0x13d   : > { %v476_v60 = vpop.f32.mrf.mxu0  ;;  %v1464_v61 = vpop.f32.mrf.mxu1 }
 0x13e   : > { %v677_v63 = vadd.f32 %v676_v59, %v646_v57  ;;  %579 = vst [vmem:[%s1419_s20 + $0x40] sm:$0xff] %v476_v60  ;;  %v609_v0 = vadd.f32 %v951_v45, %v608_v58  ;;  %595 = vst [vmem:[%s1419_s20 + $0xc0] sm:$0xff] %v1464_v61  ;;  %v648_v4 = vmul.f32 %v476_v60, %v476_v60 }
 0x13f   : > { %v955_v1 = vpop.f32.mrf.mxu0  ;;  %v1469_v2 = vpop.f32.mrf.mxu1 }
 0x140   : > { %v610_v3 = vadd.f32 %v609_v0, %v476_v60  ;;  %v678_v5 = vadd.f32 %v677_v63, %v647_v62  ;;  %582 = vst [vmem:[%s1419_s20 + $0x58] sm:$0xff] %v955_v1  ;;  %598 = vst [vmem:[%s1419_s20 + $0xd8] sm:$0xff] %v1469_v2  ;;  %v651_v18 = vmul.f32 %v955_v1, %v955_v1 }
 0x141   : > { %v479_v6 = vpop.f32.mrf.mxu0  ;;  %v1474_v7 = vpop.f32.mrf.mxu1 }
 0x142   : > { %v679_v8 = vadd.f32 %v678_v5, %v648_v4  ;;  %580 = vst [vmem:[%s1419_s20 + $0x48] sm:$0xff] %v479_v6  ;;  %v611_v9 = vadd.f32 %v610_v3, %v479_v6  ;;  %v649_v10 = vmul.f32 %v479_v6, %v479_v6  ;;  %596 = vst [vmem:[%s1419_s20 + $0xc8] sm:$0xff] %v1474_v7 }
 0x143   : > { %v958_v11 = vpop.f32.mrf.mxu0  ;;  %v1479_v12 = vpop.f32.mrf.mxu1 }
 0x144   : > { %v612_v14 = vadd.f32 %v954_v55, %v611_v9  ;;  %v680_v15 = vadd.f32 %v679_v8, %v649_v10  ;;  %585 = vst [vmem:[%s1419_s20 + $0x70] sm:$0xff] %v958_v11  ;;  %601 = vst [vmem:[%s1419_s20 + $0xf0] sm:$0xff] %v1479_v12 }
 0x145   : > { %v492_v16 = vpop.f32.mrf.mxu0  ;;  %v1486_v17 = vpop.f32.mrf.mxu1 }
 0x146   : > { %v681_v19 = vadd.f32 %v680_v15, %v650_v13  ;;  %583 = vst [vmem:[%s1419_s20 + $0x60] sm:$0xff] %v492_v16  ;;  %v613_v20 = vadd.f32 %v955_v1, %v612_v14  ;;  %599 = vst [vmem:[%s1419_s20 + $0xe0] sm:$0xff] %v1486_v17  ;;  %v652_v24 = vmul.f32 %v492_v16, %v492_v16 }
 0x147   : > { %v959_v21 = vpop.f32.mrf.mxu0  ;;  %v1491_v22 = vpop.f32.mrf.mxu1 }
 0x148   : > { %v614_v23 = vadd.f32 %v613_v20, %v492_v16  ;;  %v682_v26 = vadd.f32 %v681_v19, %v651_v18  ;;  %586 = vst [vmem:[%s1419_s20 + $0x78] sm:$0xff] %v959_v21  ;;  %602 = vst [vmem:[%s1419_s20 + $0xf8] sm:$0xff] %v1491_v22 }
 0x149   : > { %v495_v28 = vpop.f32.mrf.mxu0  ;;  %v1503_v30 = vpop.f32.mrf.mxu1 }
 0x14a   : > { %v683_v32 = vadd.f32 %v682_v26, %v652_v24  ;;  %584 = vst [vmem:[%s1419_s20 + $0x68] sm:$0xff] %v495_v28  ;;  %v615_v33 = vadd.f32 %v614_v23, %v495_v28  ;;  %v653_v34 = vmul.f32 %v495_v28, %v495_v28  ;;  %600 = vst [vmem:[%s1419_s20 + $0xe8] sm:$0xff] %v1503_v30 }
 0x14b   : > { %1149 = shalt.err (!%p1146_p0)
}
 0x14c   : > { %s1150_s11 = scalar_lea.hbm %s1496_s23, 4096  ;;  %s1154_s30 = scalar_lea.hbm %s1623_s2, 8192 }
 0x14d   : > { %p1151_p5 = scmp.ne.s32.totalorder %s1496_s23, %s1150_s11  ;;  %p1155_p4 = scmp.lt.s32.totalorder %s1496_s23, %s1623_s2 }
 0x14e   : > { %p1156_p6 = scmp.lt.s32.totalorder %s1154_s30, %s1150_s11 }
 0x14f   : > { %p1152_p2 = pnand %p1151_p5, %p1640_p11 }
 0x150   : > { %p1157_p8 = por %p1156_p6, %p1155_p4 }
 0x151   : > { %p1153_p1 = pneg %p1152_p2 }
 0x153   : > { %p1158_p3 = pnand %p1157_p8, %p1153_p1 }
 0x155   : > { %1161 = shalt.err (!%p1158_p3)
}
 0x156   : > { %s1241_s20 = smov 128   ;;  %s1242_s28 = smov 8   ;;  %v654_v35 = vmul.f32 %v958_v11, %v958_v11  ;;  %v616_v37 = vadd.f32 %v958_v11, %v615_v33  ;;  %v684_v38 = vadd.f32 %v683_v32, %v653_v34  ;;  %v655_v39 = vmul.f32 %v959_v21, %v959_v21 }
 0x157   : > { %998 = dma.vmem_to_hbm [thread:$0]  (%p1640_p11), %s1498_s29, 4096, %s1496_s23, %s713_s25, %s1241_s20, %s1241_s20, %s1242_s28   ;;  %v656_v43 = vmul.f32 %v1424_v27, %v1424_v27  ;;  %v657_v48 = vmul.f32 %v1434_v31, %v1434_v31  ;;  %v658_v50 = vmul.f32 %v1417_v25, %v1417_v25  ;;  %v659_v54 = vmul.f32 %v1429_v29, %v1429_v29 }
 0x158   : > { %v617_v40 = vadd.f32 %v959_v21, %v616_v37  ;;  %v685_v42 = vadd.f32 %v684_v38, %v654_v35  ;;  %v660_v58 = vmul.f32 %v1444_v41, %v1444_v41  ;;  %v661_v62 = vmul.f32 %v1454_v51, %v1454_v51  ;;  %s870_s29 = sshll.u32 %s1386_s26, 1  ;;  %s899_s17 = sshll.u32 %s1285_s16, 5 }
 0x159   : > { %v664_v4 = vmul.f32 %v1464_v61, %v1464_v61  ;;  %v665_v8 = vmul.f32 %v1474_v7, %v1474_v7  ;;  %v668_v14 = vmul.f32 %v1486_v17, %v1486_v17  ;;  %v670_v18 = vmul.f32 %v1479_v12, %v1479_v12  ;;  %s214_s22 = scalar_lea.vmem [#allocation8], %s870_s29  ;;  %s1584_s9 = scalar_lea.hbm %s1624_s3, %s899_s17 }
 0x15a   : > { %v686_v44 = vadd.f32 %v685_v42, %v655_v39  ;;  %v618_v45 = vadd.f32 %v617_v40, %v1424_v27  ;;  %s747_s23 = sshll.u32 %s214_s22, 4  ;;  %vm709_vm0 = vcmask 1040384   ;;  %s718_s7 = scalar_lea.sflag [#allocation9], %s1386_s26  ;;  %s748_s23 = int_to_ptr.vmem [resolvable:$true] %s747_s23 }
 0x15b   : > { %s1162_s10 = scalar_lea.vmem %s748_s23, 32  ;;  %s1243_s16 = smov [#allocation8]  }
 0x15c   : > { %v619_v47 = vadd.f32 %v618_v45, %v1434_v31  ;;  %v687_v49 = vadd.f32 %v686_v44, %v656_v43  ;;  %p1163_p7 = scmp.ne.s32.totalorder %s748_s23, %s1162_s10  ;;  %s1166_s11 = sshll.u32 %s1243_s16, 4  ;;  %s1167_s11 = int_to_ptr.vmem [resolvable:$false] %s1166_s11 }
 0x15d   : > { %s1168_s21 = scalar_lea.vmem %s1167_s11, 64  ;;  %p1169_p12 = scmp.lt.s32.totalorder %s748_s23, %s1167_s11 }
 0x15e   : > { %v620_v52 = vadd.f32 %v1417_v25, %v619_v47  ;;  %v688_v53 = vadd.f32 %v687_v49, %v657_v48  ;;  %v662_v25 = vmul.f32 %v1439_v36, %v1439_v36  ;;  %p1164_p9 = pnand %p1163_p7, %p1640_p11  ;;  %p1170_p13 = scmp.lt.s32.totalorder %s1168_s21, %s1162_s10 }
 0x160   : > { %v689_v55 = vadd.f32 %v688_v53, %v658_v50  ;;  %v621_v57 = vadd.f32 %v1429_v29, %v620_v52  ;;  %v663_v29 = vmul.f32 %v1449_v46, %v1449_v46  ;;  %p1165_p10 = pneg %p1164_p9  ;;  %p1171_p0 = por %p1170_p13, %p1169_p12 }
 0x162   : > { %v622_v27 = vadd.f32 %v621_v57, %v1444_v41  ;;  %v690_v59 = vadd.f32 %v689_v55, %v659_v54  ;;  %p1172_p5 = pnand %p1171_p0, %p1165_p10 }
 0x164   : > { %v691_v31 = vadd.f32 %v690_v59, %v660_v58  ;;  %v623_v60 = vadd.f32 %v622_v27, %v1454_v51 }
 0x166   : > { %v624_v63 = vadd.f32 %v1439_v36, %v623_v60  ;;  %v692_v0 = vadd.f32 %v691_v31, %v661_v62  ;;  %v666_v36 = vmul.f32 %v1459_v56, %v1459_v56 }
 0x168   : > { %v693_v1 = vadd.f32 %v692_v0, %v662_v25  ;;  %v625_v3 = vadd.f32 %v1449_v46, %v624_v63  ;;  %v667_v46 = vmul.f32 %v1469_v2, %v1469_v2 }
 0x16a   : > { %v626_v41 = vadd.f32 %v625_v3, %v1464_v61  ;;  %v694_v5 = vadd.f32 %v693_v1, %v663_v29 }
 0x16c   : > { %v695_v6 = vadd.f32 %v694_v5, %v664_v4  ;;  %v627_v51 = vadd.f32 %v626_v41, %v1474_v7 }
 0x16e   : > { %v628_v9 = vadd.f32 %v1459_v56, %v627_v51  ;;  %v696_v10 = vadd.f32 %v695_v6, %v665_v8  ;;  %v669_v56 = vmul.f32 %v1503_v30, %v1503_v30 }
 0x170   : > { %v697_v11 = vadd.f32 %v696_v10, %v666_v36  ;;  %v629_v13 = vadd.f32 %v1469_v2, %v628_v9  ;;  %v671_v2 = vmul.f32 %v1491_v22, %v1491_v22 }
 0x172   : > { %v630_v61 = vadd.f32 %v629_v13, %v1486_v17  ;;  %v698_v15 = vadd.f32 %v697_v11, %v667_v46 }
 0x174   : > { %v699_v7 = vadd.f32 %v698_v15, %v668_v14  ;;  %v631_v16 = vadd.f32 %v630_v61, %v1503_v30 }
 0x176   : > { %v632_v19 = vadd.f32 %v1479_v12, %v631_v16  ;;  %v700_v20 = vadd.f32 %v699_v7, %v669_v56 }
 0x178   : > { %v633_v17 = vadd.f32 %v1491_v22, %v632_v19  ;;  %v701_v21 = vadd.f32 %v700_v20, %v670_v18 }
 0x17a   : > { %v634_v23 = vrot.slane %v633_v17, 4  ;;  %v702_v24 = vadd.f32 %v701_v21, %v671_v2 }
 0x17c   : > { %v635_v26 = vadd.f32 %v634_v23, %v633_v17  ;;  %v703_v28 = vrot.slane %v702_v24, 4 }
 0x17e   : > { %v636_v32 = vrot.slane %v635_v26, 2  ;;  %v704_v33 = vadd.f32 %v703_v28, %v702_v24 }
 0x180   : > { %v637_v30 = vadd.f32 %v636_v32, %v635_v26  ;;  %v705_v34 = vrot.slane %v704_v33, 2 }
 0x182   : > { %v638_v35 = vrot.slane %v637_v30, 1  ;;  %v706_v12 = vadd.f32 %v705_v34, %v704_v33 }
 0x184   : > { %v707_v37 = vrot.slane %v706_v12, 1  ;;  %v639_v22 = vadd.f32 %v638_v35, %v637_v30 }
 0x186   : > { %v708_v38 = vadd.f32 %v707_v37, %v706_v12 }
 0x188   : > { %v710_v39 = vsel %vm709_vm0, %v639_v22, %v708_v38 }
 0x189   : > { %711 = vst [vmem:[%s214_s22] sm:$0x3] %v710_v39 }
 0x18a   : > { %1175 = shalt.err (!%p1172_p5)
}
 0x18b   : > { %s1176_s27 = scalar_lea.hbm %s1584_s9, 32  ;;  %s1180_s4 = scalar_lea.hbm %s1624_s3, 64 }
 0x18c   : > { %p1177_p2 = scmp.ne.s32.totalorder %s1584_s9, %s1176_s27  ;;  %p1181_p6 = scmp.lt.s32.totalorder %s1584_s9, %s1624_s3 }
 0x18d   : > { %p1182_p8 = scmp.lt.s32.totalorder %s1180_s4, %s1176_s27 }
 0x18e   : > { %p1178_p1 = pnand %p1177_p2, %p1640_p11 }
 0x18f   : > { %p1183_p3 = por %p1182_p8, %p1181_p6 }
 0x190   : > { %p1179_p4 = pneg %p1178_p1 }
 0x192   : > { %p1184_p7 = pnand %p1183_p3, %p1179_p4 }
 0x194   : > { %1187 = shalt.err (!%p1184_p7)
}
 0x195   : > { %999 = dma.vmem_to_hbm [thread:$0]  (%p1640_p11), %s748_s23, 32, %s1584_s9, %s718_s7  }
 0x196 PF: > { %s759_s28 = sand.u32 1, %s1222_s12   ;;  %p1641_p9 = scmp.ne.s32.totalorder %s1630_s19, 0 }
 0x197   : > { %p1642_p10 = scmp.ge.s32.totalorder %s1234_s15, 2  ;;  %s760_s29 = scalar_lea.sflag [#allocation4], %s759_s28 }
 0x199   : > { %p1011_p12 = pnand %p1642_p10, %p1641_p9 }
 0x19b   : > { %p1012_p13 = pneg %p1011_p12 }
 0x19d   : > { %1213 = dma.done.wait (%p1012_p13), %s760_s29, 4096  }
 0x19e   : > { %1215 = vsyncadd (%p1012_p13), %s760_s29, 4294963200  ;;  %s769_s17 = scalar_lea.sflag [#allocation9], %s759_s28 }
 0x19f   : > { %1217 = dma.done.wait (%p1012_p13), %s769_s17, 32  }
 0x1a0   : > { %1219 = vsyncadd (%p1012_p13), %s769_s17, 4294967264  ;;  %p21_p11 = scmp.ge.s32.totalorder %s1318_s24, 4   ;;  %s1643_s12 = smov %s1226_s13 }
 0x1a1   : > { %s1644_s13 = smov %s1230_s14  ;;  %s1645_s14 = smov %s1338_s5 }
 0x1a2   : > { %s1646_s15 = smov %s1318_s24  ;;  %23 = sbr.rel (!%p21_p11) target bundleno = 8 (0x8), region = 94 }
 0x1a7   :  { %774 = vsyncpa [#allocation3], 1 }
 0x1a8   :  { %776 = vsyncpa [#allocation3 + $0x1], 1 }
 0x1a9   :  { %777 = vsyncpa [#allocation6], 1 }
 0x1aa   :  { %778 = vsyncpa [#allocation4], 1 }
 0x1ab   :  { %780 = vsyncpa [#allocation4 + $0x1], 1 }
 0x1ac   :  { %781 = vsyncpa [#allocation9], 1 }
 0x1ad   :  { %783 = vsyncpa [#allocation9 + $0x1], 1 }

</bundles_post_ra>
